<compile_context>
chip_gen: v6e
topology: v6e:2x2x1
jax: 0.10.0
libtpu: 0.0.40
codegen_flags: <defaults>
</compile_context>

<pallas_src>
import functools

import jax
import jax.numpy as jnp
from jax.experimental import pallas as pl
from jax.experimental.pallas import tpu as pltpu


# ---------------------------------------------------------------------------
# Pass 1: fused Q/K/V projection (folded 1x1 conv + batchnorm), once per element.
# ---------------------------------------------------------------------------
def _qkv_proj_kernel(x_ref, w_ref, b_ref, q_ref, kv_ref, *, c_out):
    # x tile: (C_in, tp) in the input dtype; cast to the MXU compute dtype here
    # (no wrapper-side astype pass).
    x = x_ref[...].astype(w_ref.dtype)
    proj = jnp.dot(w_ref[...], x, preferred_element_type=jnp.float32) + b_ref[...]
    q_ref[...] = proj[:c_out, :].astype(q_ref.dtype)        # (C_out, tp)
    kv_ref[...] = proj[c_out:, :].astype(kv_ref.dtype)      # (2*C_out, tp)


# ---------------------------------------------------------------------------
# Pass 2: flash-style attention with online softmax over key tiles.
# ---------------------------------------------------------------------------
def _attention_kernel(q_ref, kv_ref, o_ref, m_scr, l_scr, acc_scr, *,
                      c_out, seq_len, tk, mask_keys, exp_dtype, approx_recip):
    ki = pl.program_id(2)
    nk = pl.num_programs(2)

    @pl.when(ki == 0)
    def _init():
        m_scr[...] = jnp.full(m_scr.shape, -jnp.inf, dtype=m_scr.dtype)
        l_scr[...] = jnp.zeros(l_scr.shape, dtype=l_scr.dtype)
        acc_scr[...] = jnp.zeros(acc_scr.shape, dtype=acc_scr.dtype)

    k = kv_ref[:c_out, :]                     # (C_out, tk)
    v = kv_ref[c_out:, :]                     # (C_out, tk)

    # Scores in (key, query) layout: s[s, t] = sum_c k[c, s] * q[c, t].
    # dot_general contracts the channel axis of both operands -> no transposes.
    s = jax.lax.dot_general(
        k, q_ref[...],
        dimension_numbers=(((0,), (0,)), ((), ())),
        preferred_element_type=jnp.float32)   # (tk, tq) f32

    if mask_keys:  # static: only emitted when T was padded up to a 128 multiple
        key_idx = ki * tk + jax.lax.broadcasted_iota(jnp.int32, (tk, 1), 0)
        s = jnp.where(key_idx < seq_len, s, jnp.float32(-1e30))

    # Online softmax over the key axis (axis 0), carried across the ki grid axis.
    m_prev = m_scr[...]                                           # (1, tq)
    m_new = jnp.maximum(m_prev, jnp.max(s, axis=0, keepdims=True))
    alpha = jnp.exp(m_prev - m_new)                               # (1, tq) f32
    p = jnp.exp((s - m_new).astype(exp_dtype))                    # (tk, tq)
    l_scr[...] = alpha * l_scr[...] + jnp.sum(p, axis=0, keepdims=True,
                                              dtype=jnp.float32)
    acc_scr[...] = alpha * acc_scr[...] + jnp.dot(
        v, p.astype(v.dtype), preferred_element_type=jnp.float32)
    m_scr[...] = m_new

    @pl.when(ki == nk - 1)
    def _finalize():
        inv_l = pl.reciprocal(l_scr[...], approx=approx_recip)    # (1, tq)
        o_ref[...] = (acc_scr[...] * inv_l).astype(o_ref.dtype)   # (C_out, tq)


# ---------------------------------------------------------------------------
# Wrapper
# ---------------------------------------------------------------------------
def _round_up(x, m):
    return ((x + m - 1) // m) * m


def _pick_tile(t_pad, max_tile):
    """Largest of (max_tile, 512, 256, 128) that divides t_pad (a 128 multiple)."""
    for cand in (max_tile, 512, 256, 128):
        if cand <= max_tile and t_pad % cand == 0:
            return cand
    return 128


def _has_bf16_eup():
    """bf16 transcendentals exist on v6e/v7x; v5e (and older) only have f32."""
    try:
        kind = jax.devices()[0].device_kind.lower()
    except Exception:
        return False
    return any(tag in kind for tag in ("v6", "v7", "7x"))


def self_attention_pallas(x, wq, bq, wk, bk, wv, bv, *,
                          q_tile=None, kv_tile=None, proj_tile=None,
                          compute_dtype=jnp.bfloat16, exp_dtype=None):
    """x: (B, C_in, T); w*: (C_out, C_in); b*: (C_out, 1). Returns (B, C_out, T)."""
    B, C_in, T = x.shape
    C_out = wq.shape[0]
    out_dtype = x.dtype

    # Pad T up to a 128 multiple so every store stays lane-dense; padded key
    # positions are masked to -1e30 before the softmax inside the kernel.
    T_pad = _round_up(T, 128)
    tq = q_tile if q_tile is not None else _pick_tile(T_pad, 512)
    tk = kv_tile if kv_tile is not None else _pick_tile(T_pad, 1024)
    tp = proj_tile if proj_tile is not None else _pick_tile(T_pad, 512)
    assert T_pad % tq == 0 and T_pad % tk == 0 and T_pad % tp == 0, \
        "tiles must divide the padded sequence length"

    if exp_dtype is None:
        exp_dtype = (jnp.bfloat16
                     if (compute_dtype == jnp.bfloat16 and _has_bf16_eup())
                     else jnp.float32)

    if T_pad != T:
        x = jnp.pad(x, ((0, 0), (0, 0), (0, T_pad - T)))

    # Fuse the three projections into one tall matmul; biases stay f32 (added post-MXU).
    w_all = jnp.concatenate([wq, wk, wv], axis=0).astype(compute_dtype)  # (3*C_out, C_in)
    b_all = jnp.concatenate([bq, bk, bv], axis=0).astype(jnp.float32)    # (3*C_out, 1)

    vmem_limit = 48 * 1024 * 1024

    # --- Pass 1: project Q and K/V once, lane-dense, in the compute dtype. ---
    proj_kernel = functools.partial(_qkv_proj_kernel, c_out=C_out)
    q_proj, kv_proj = pl.pallas_call(
        proj_kernel,
        out_shape=(jax.ShapeDtypeStruct((B, C_out, T_pad), compute_dtype),
                   jax.ShapeDtypeStruct((B, 2 * C_out, T_pad), compute_dtype)),
        grid_spec=pltpu.PrefetchScalarGridSpec(
            num_scalar_prefetch=0,
            grid=(B, T_pad // tp),
            in_specs=[
                pl.BlockSpec((None, C_in, tp), lambda b, ti: (b, 0, ti)),     # x tile
                pl.BlockSpec((3 * C_out, C_in), lambda b, ti: (0, 0)),        # fused W
                pl.BlockSpec((3 * C_out, 1), lambda b, ti: (0, 0)),           # fused bias
            ],
            out_specs=[
                pl.BlockSpec((None, C_out, tp), lambda b, ti: (b, 0, ti)),    # Q
                pl.BlockSpec((None, 2 * C_out, tp), lambda b, ti: (b, 0, ti)),  # K/V
            ],
        ),
        compiler_params=pltpu.CompilerParams(
            dimension_semantics=("parallel", "parallel"),
            vmem_limit_bytes=vmem_limit),
    )(x, w_all, b_all)

    # --- Pass 2: flash attention over the projected tiles. ---
    attn_kernel = functools.partial(
        _attention_kernel,
        c_out=C_out, seq_len=T, tk=tk, mask_keys=(T_pad != T),
        exp_dtype=exp_dtype,
        approx_recip=(compute_dtype != jnp.float32))

    out = pl.pallas_call(
        attn_kernel,
        out_shape=jax.ShapeDtypeStruct((B, C_out, T_pad), out_dtype),
        grid_spec=pltpu.PrefetchScalarGridSpec(
            num_scalar_prefetch=0,
            grid=(B, T_pad // tq, T_pad // tk),
            in_specs=[
                # q block index is constant across ki -> pipeline keeps it resident.
                pl.BlockSpec((None, C_out, tq), lambda b, qi, ki: (b, 0, qi)),
                pl.BlockSpec((None, 2 * C_out, tk), lambda b, qi, ki: (b, 0, ki)),
            ],
            out_specs=pl.BlockSpec((None, C_out, tq), lambda b, qi, ki: (b, 0, qi)),
            scratch_shapes=[
                pltpu.VMEM((1, tq), jnp.float32),        # running max m
                pltpu.VMEM((1, tq), jnp.float32),        # running denom l
                pltpu.VMEM((C_out, tq), jnp.float32),    # output accumulator
            ],
        ),
        compiler_params=pltpu.CompilerParams(
            dimension_semantics=("parallel", "parallel", "arbitrary"),
            vmem_limit_bytes=vmem_limit),
    )(q_proj, kv_proj)

    return out[:, :, :T] if T_pad != T else out


# ---------------------------------------------------------------------------
# Parameter folding + pure-JAX reference
# ---------------------------------------------------------------------------
def fold_conv_bn(conv_w, gamma, beta, running_mean, running_var, eps=1e-5):
    """Fold 1x1 Conv1d (no bias) + BatchNorm1d (eval) into (W_eff, b_eff)."""
    scale = gamma / jnp.sqrt(running_var + eps)            # (C_out,)
    w_eff = conv_w * scale[:, None]                        # (C_out, C_in)
    b_eff = (beta - scale * running_mean)[:, None]         # (C_out, 1)
    return w_eff.astype(jnp.float32), b_eff.astype(jnp.float32)


def make_params(key, c_in, c_out, w_scale=0.2):
    keys = jax.random.split(key, 15)
    params = []
    for i in range(3):  # q, k, v
        conv_w = jax.random.normal(keys[5 * i + 0], (c_out, c_in), jnp.float32) * w_scale
        gamma = 1.0 + 0.1 * jax.random.normal(keys[5 * i + 1], (c_out,), jnp.float32)
        beta = 0.1 * jax.random.normal(keys[5 * i + 2], (c_out,), jnp.float32)
        mean = 0.1 * jax.random.normal(keys[5 * i + 3], (c_out,), jnp.float32)
        var = jnp.abs(jax.random.normal(keys[5 * i + 4], (c_out,), jnp.float32)) + 0.5
        params.append(fold_conv_bn(conv_w, gamma, beta, mean, var))
    return params  # [(wq, bq), (wk, bk), (wv, bv)]


def self_attention_ref(x, wq, bq, wk, bk, wv, bv):
    # Pure-JAX reference mirroring the PyTorch forward.
    q = jnp.einsum("oc,bct->bot", wq, x) + bq[None]        # (B, C_out, T)
    k = jnp.einsum("oc,bct->bot", wk, x) + bk[None]
    v = jnp.einsum("oc,bct->bot", wv, x) + bv[None]
    w = jnp.einsum("bct,bcs->bts", q, k)                   # (B, T, T)
    p = jax.nn.softmax(w, axis=-1)
    return jnp.einsum("bos,bts->bot", v, p)                # (B, C_out, T)


if __name__ == "__main__":
    key = jax.random.PRNGKey(0)
    kx, kp, kx2, kp2, kx3 = jax.random.split(key, 5)

    # --- Test 1: toy shapes, T=16 (padded to 128, key masking), exact f32 path ---
    B, C_in, C_out, T = 2, 4, 8, 16
    x = jax.random.normal(kx, (B, C_in, T), jnp.float32)
    (wq, bq), (wk, bk), (wv, bv) = make_params(kp, C_in, C_out)

    out = jax.block_until_ready(
        self_attention_pallas(x, wq, bq, wk, bk, wv, bv, compute_dtype=jnp.float32))
    ref = self_attention_ref(x, wq, bq, wk, bk, wv, bv)
    assert out.shape == (B, C_out, T)
    assert jnp.allclose(out, ref, atol=1e-4, rtol=1e-4), "f32 padded path mismatch"

    # --- Test 2: larger T, multi-tile online softmax, exact f32 path ---
    B2, C_in2, C_out2, T2 = 2, 16, 8, 256
    x2 = jax.random.normal(kx2, (B2, C_in2, T2), jnp.float32)
    (wq2, bq2), (wk2, bk2), (wv2, bv2) = make_params(kp2, C_in2, C_out2, w_scale=0.1)

    out2 = jax.block_until_ready(
        self_attention_pallas(x2, wq2, bq2, wk2, bk2, wv2, bv2,
                              q_tile=128, kv_tile=128, compute_dtype=jnp.float32))
    ref2 = self_attention_ref(x2, wq2, bq2, wk2, bk2, wv2, bv2)
    assert jnp.allclose(out2, ref2, atol=1e-4, rtol=1e-4), "tiled f32 path mismatch"

    # --- Test 3: same shapes, default bf16 MXU path (f32 accumulation) ---
    out3 = jax.block_until_ready(
        self_attention_pallas(x2, wq2, bq2, wk2, bk2, wv2, bv2,
                              q_tile=128, kv_tile=128))
    assert jnp.allclose(out3, ref2, atol=5e-2, rtol=5e-2), "bf16 path mismatch"

    # --- Test 4: T=200 (pad to 256), multi-tile kv with a partially masked tile ---
    B4, C_in4, C_out4, T4 = 2, 16, 8, 200
    x4 = jax.random.normal(kx3, (B4, C_in4, T4), jnp.float32)
    out4 = jax.block_until_ready(
        self_attention_pallas(x4, wq2, bq2, wk2, bk2, wv2, bv2,
                              q_tile=128, kv_tile=128, compute_dtype=jnp.float32))
    ref4 = self_attention_ref(x4, wq2, bq2, wk2, bk2, wv2, bv2)
    assert out4.shape == (B4, C_out4, T4)
    assert jnp.allclose(out4, ref4, atol=1e-4, rtol=1e-4), "padded multi-tile mismatch"

    print("KERNEL_OK")
</pallas_src>

<mosaic_0001>
module attributes {stable_mosaic.version = 11 : i64} {
  func.func @_qkv_proj_kernel(%arg0: i32, %arg1: i32, %arg2: memref<1x4x128xf32, #tpu.memory_space<vmem>>, %arg3: memref<24x4xf32, #tpu.memory_space<vmem>>, %arg4: memref<24x1xf32, #tpu.memory_space<vmem>>, %arg5: memref<1x8x128xf32, #tpu.memory_space<vmem>>, %arg6: memref<1x16x128xf32, #tpu.memory_space<vmem>>) attributes {dimension_semantics = [#tpu.dimension_semantics<parallel>, #tpu.dimension_semantics<parallel>], iteration_bounds = array<i64: 2, 1>, scalar_prefetch = 0 : i64, scratch_operands = 0 : i64, tpu.core_type = #tpu.core_type<tc>, window_params = [{transform_indices = @transform_0, window_bounds = array<i64: 1, 4, 128>}, {pipeline_mode = #tpu.pipeline_mode<synchronous>, transform_indices = @transform_1, window_bounds = array<i64: 24, 4>}, {pipeline_mode = #tpu.pipeline_mode<synchronous>, transform_indices = @transform_2, window_bounds = array<i64: 24, 1>}, {transform_indices = @transform_3, window_bounds = array<i64: 1, 8, 128>}, {transform_indices = @transform_4, window_bounds = array<i64: 1, 16, 128>}]} {
    %c0 = arith.constant 0 : index
    %c0_0 = arith.constant 0 : index
    %c0_1 = arith.constant 0 : index
    %0 = vector.load %arg2[%c0, %c0_0, %c0_1] : memref<1x4x128xf32, #tpu.memory_space<vmem>>, vector<1x4x128xf32>
    %1 = vector.shape_cast %0 : vector<1x4x128xf32> to vector<4x128xf32>
    %c0_2 = arith.constant 0 : index
    %c0_3 = arith.constant 0 : index
    %2 = vector.load %arg3[%c0_2, %c0_3] : memref<24x4xf32, #tpu.memory_space<vmem>>, vector<24x4xf32>
    %cst = arith.constant dense<0.000000e+00> : vector<24x128xf32>
    %3 = tpu.matmul %2, %1, %cst {dimension_numbers = #tpu.dot_dimension_numbers<[1], [0], [0], [1], [0, 0, 1, 1], [], []>} : vector<24x4xf32>, vector<4x128xf32>, vector<24x128xf32> -> vector<24x128xf32>
    %c0_4 = arith.constant 0 : index
    %c0_5 = arith.constant 0 : index
    %4 = vector.load %arg4[%c0_4, %c0_5] : memref<24x1xf32, #tpu.memory_space<vmem>>, vector<24x1xf32>
    %5 = vector.broadcast %4 : vector<24x1xf32> to vector<24x128xf32>
    %6 = arith.addf %3, %5 : vector<24x128xf32>
    %7 = vector.extract_strided_slice %6 {offsets = [0, 0], sizes = [8, 128], strides = [1, 1]} : vector<24x128xf32> to vector<8x128xf32>
    %c0_6 = arith.constant 0 : index
    %c0_7 = arith.constant 0 : index
    %c0_8 = arith.constant 0 : index
    %8 = vector.load %arg5[%c0_6, %c0_7, %c0_8] : memref<1x8x128xf32, #tpu.memory_space<vmem>>, vector<1x8x128xf32>
    %9 = vector.shape_cast %8 : vector<1x8x128xf32> to vector<8x128xf32>
    %10 = vector.shape_cast %7 : vector<8x128xf32> to vector<1x8x128xf32>
    tpu.vector_store %arg5[%c0_6, %c0_7, %c0_8], %10 {strides = array<i32>} : memref<1x8x128xf32, #tpu.memory_space<vmem>>, vector<1x8x128xf32>,
    %11 = vector.extract_strided_slice %6 {offsets = [8, 0], sizes = [16, 128], strides = [1, 1]} : vector<24x128xf32> to vector<16x128xf32>
    %c0_9 = arith.constant 0 : index
    %c0_10 = arith.constant 0 : index
    %c0_11 = arith.constant 0 : index
    %12 = vector.load %arg6[%c0_9, %c0_10, %c0_11] : memref<1x16x128xf32, #tpu.memory_space<vmem>>, vector<1x16x128xf32>
    %13 = vector.shape_cast %12 : vector<1x16x128xf32> to vector<16x128xf32>
    %14 = vector.shape_cast %11 : vector<16x128xf32> to vector<1x16x128xf32>
    tpu.vector_store %arg6[%c0_9, %c0_10, %c0_11], %14 {strides = array<i32>} : memref<1x16x128xf32, #tpu.memory_space<vmem>>, vector<1x16x128xf32>,
    return
  }
  func.func @transform_0(%arg0: i32, %arg1: i32) -> (i32, i32, i32) {
    %c0_i32 = arith.constant 0 : i32
    %c0_i32_0 = arith.constant 0 : i32
    return %arg0, %c0_i32, %arg1 : i32, i32, i32
  }
  func.func @transform_1(%arg0: i32, %arg1: i32) -> (i32, i32) {
    %c0_i32 = arith.constant 0 : i32
    %c0_i32_0 = arith.constant 0 : i32
    %c0_i32_1 = arith.constant 0 : i32
    return %c0_i32, %c0_i32_0 : i32, i32
  }
  func.func @transform_2(%arg0: i32, %arg1: i32) -> (i32, i32) {
    %c0_i32 = arith.constant 0 : i32
    %c0_i32_0 = arith.constant 0 : i32
    %c0_i32_1 = arith.constant 0 : i32
    return %c0_i32, %c0_i32_0 : i32, i32
  }
  func.func @transform_3(%arg0: i32, %arg1: i32) -> (i32, i32, i32) {
    %c0_i32 = arith.constant 0 : i32
    %c0_i32_0 = arith.constant 0 : i32
    return %arg0, %c0_i32, %arg1 : i32, i32, i32
  }
  func.func @transform_4(%arg0: i32, %arg1: i32) -> (i32, i32, i32) {
    %c0_i32 = arith.constant 0 : i32
    %c0_i32_0 = arith.constant 0 : i32
    return %arg0, %c0_i32, %arg1 : i32, i32, i32
  }
}

</mosaic_0001>

<bundles_post_ra>
// kernel: tpu_custom_call.1
= control target key start
LH: loop header
LB: loop body
LE: loop exit
PB: predicated region body
PF: predicated region fallthrough
CT: control target
= control target key end

     0   :  { %10 = vsyncpa [#allocation3], 0  ;;  %s911_s0 = inlined_call_operand.vmem [shape: f32[2,4,128], index: 0, kind: input, shape index: {}]   ;;  %s912_s1 = inlined_call_operand.vmem [shape: f32[24,4], index: 1, kind: input, shape index: {}]   ;;  %s913_s2 = inlined_call_operand.vmem [shape: f32[24,1], index: 2, kind: input, shape index: {}]   ;;  %s914_s3 = inlined_call_operand.hbm [shape: f32[2,8,128], index: 3, kind: output, shape index: {0}]   ;;  %s915_s4 = inlined_call_operand.hbm [shape: f32[2,16,128], index: 4, kind: output, shape index: {1}]  }
   0x1   :  { %12 = vsyncpa [#allocation3 + $0x1], 0 }
   0x2   :  { %13 = vsyncpa [#allocation5], 0 }
   0x3   :  { %15 = vsyncpa [#allocation5 + $0x1], 0  ;;  %s736_s15 = smov 0   ;;  %s738_s16 = smov 0  }
   0x4   :  { %s740_s17 = smov 0   ;;  %s742_s18 = smov 0  }
   0x5   :  { %s744_s19 = smov 0   ;;  %s746_s20 = smov 0  }
   0x6 LB: > { %s492_s21 = sadd.s32 4294967295, %s702_s20   ;;  %s493_s22 = sadd.s32 4294967294, %s702_s20   ;;  %s702_s20 = sphi %s746_s20, %s21_s20   ;;  %s698_s19 = sphi %s744_s19, %s922_s19   ;;  %s694_s18 = sphi %s742_s18, %s921_s18   ;;  %s690_s17 = sphi %s740_s17, %s920_s17   ;;  %s686_s16 = sphi %s738_s16, %s919_s16   ;;  %s682_s15 = sphi %s736_s15, %s918_s15  }
   0x7   : > { %s33_s23 = sadd.s32 1, %s698_s19  ;;  %s112_s24 = sadd.s32 1, %s690_s17 }
   0x8   : > { %p35_p0 = scmp.ge.s32.totalorder %s33_s23, 2  ;;  %p122_p1 = scmp.ne.s32.totalorder %s690_s17, %s686_s16 }
   0x9   : > { %p123_p2 = scmp.eq.s32.totalorder %s492_s21, 1  ;;  %p128_p3 = scmp.ne.s32.totalorder %s686_s16, %s682_s15 }
   0xa   : > { %s924_s23 = smov (%p35_p0, %s33_s23), 0  ;;  %p129_p5 = scmp.eq.s32.totalorder %s493_s22, 1 }
   0xb   : > { %p776_p4 = por %p123_p2, %p122_p1  ;;  %s107_s26 = ssub.s32 %s698_s19, %s924_s23 }
   0xc   : > { %p496_p6 = scmp.ge.s32.totalorder %s702_s20, 1  ;;  %p110_p7 = scmp.eq.s32.totalorder %s107_s26, 0 }
   0xd   : > { %p783_p8 = por %p129_p5, %p128_p3  ;;  %p191_p9 = scmp.lt.s32.totalorder %s702_s20, 3 }
   0xe   : > { %s789_s28 = scalar_select %p110_p7, %s690_s17, %s112_s24  }
   0xf   : > { %p192_p10 = pnand %p496_p6, %p191_p9 }
  0x10   : > { %p224_p11 = scmp.lt.s32.totalorder (!%p192_p10), %s694_s18, 1  ;;  %s818_s30 = sand.u32 (!%p192_p10), 1, %s686_s16  }
  0x11   : > { %195 = sbr.rel (%p192_p10) target bundleno = 260 (0x104), region = 32  ;;  %s498_s6 = sshll.u32 (!%p192_p10), %s818_s30, 4 }
  0x12   : > { %s506_s7 = sshll.u32 (!%p192_p10), %s694_s18, 7  ;;  %s823_s10 = scalar_lea.vmem (!%p192_p10), [#allocation4], %s498_s6 }
  0x13   : > { %s829_s14 = scalar_lea.hbm (!%p192_p10), %s914_s3, %s506_s7  ;;  %s511_s21 = sshll.u32 (!%p192_p10), %s694_s18, 8 }
  0x14   : > { %s351_s22 = scalar_lea.sflag (!%p192_p10), [#allocation3], %s818_s30  ;;  %s707_s26 = smov (!%p192_p10), [#allocation2]  }
  0x15   : > { %s600_s29 = sshll.u32 (!%p192_p10), %s707_s26, 4  ;;  %s601_s29 = int_to_ptr.vmem [resolvable:$false] %s600_s29 }
  0x16   : > { %v704_v0 = vmov 0.0   ;;  %v235_v1 = vld [vmem:[%s913_s2] sm:$0xff]  ;;  %s225_s5 = scalar_select %p224_p11, %s694_s18, 1  ;;  %vm705_vm0 = vmmov 0   ;;  %v237_v2 = vld [vmem:[%s913_s2 + $0x10] sm:$0xff]  ;;  %v706_v3 = vmov 0  }
  0x17   : > { %516 = vmatprep.subr.mxu0 %v704_v0  ;;  %527 = vmatprep.subr.mxu1 %v704_v0  ;;  %vm263_vm1 = vcmask 1043456   ;;  %v232_v4 = vld [vmem:[%s912_s1] sm:$0xff]  ;;  %vm253_vm2 = vcmask 31744   ;;  %v233_v5 = vld [vmem:[%s912_s1 + $0x8] sm:$0xff]  ;;  %v234_v8 = vld [vmem:[%s912_s1 + $0x10] sm:$0xff] }
  0x18   : > { %518 = vmatprep.mubr.msk.f32.mxu0 %vm705_vm0, %v704_v0  ;;  %521 = vmatprep.mubr.msk.f32.mxu1 %vm705_vm0, %v704_v0  ;;  %s499_s8 = sshll.u32 %s225_s5, 2  ;;  %v236_v7 = vld [vmem:[%s913_s2 + $0x8] sm:$0xff]  ;;  %s497_s5 = sshll.u32 %s818_s30, 3 }
  0x19   : > { %594 = vset.pattern.permute.xlu0 %v706_v3  ;;  %595 = vset.pattern.permute.xlu1 %v706_v3  ;;  %s230_s11 = scalar_lea.vmem %s911_s0, %s499_s8  ;;  %s216_s8 = scalar_lea.vmem [#allocation2], %s497_s5 }
  0x1a   : > { %240 = vperm.xlu0 %594, %v235_v1   ;;  %250 = vperm.xlu1 %595, %v237_v2   ;;  %v231_v6 = vld [vmem:[%s230_s11] sm:$0xf]  ;;  %s370_s9 = sshll.u32 %s216_s8, 4  ;;  %s384_s11 = sshll.u32 %s823_s10, 4  ;;  %s831_s9 = int_to_ptr.vmem [resolvable:$true] %s370_s9  ;;  %s833_s11 = int_to_ptr.vmem [resolvable:$true] %s384_s11 }
  0x1b   : > { %517 = vmatpush3.msk.msra.mxu0 %vm263_vm1, %v231_v6  ;;  %528 = vmatpush3.msk.msra.mxu1 %vm263_vm1, %v231_v6  ;;  %s596_s24 = scalar_lea.vmem %s831_s9, 128  ;;  %s602_s5 = scalar_lea.vmem %s601_s29, 256 }
  0x1c   : > { %519 = vmatmul.mubr.msk.f32.vlgmr.msra.gmra.mxu0 %vm253_vm2, %v232_v4  ;;  %522 = vmatmul.mubr.msk.f32.vlgmr.msra.gmra.mxu1 %vm253_vm2, %v233_v5  ;;  %p597_p12 = scmp.ne.s32.totalorder %s831_s9, %s596_s24  ;;  %p603_p1 = scmp.lt.s32.totalorder %s831_s9, %s601_s29 }
  0x1d   : > { %524 = vmatprep.mubr.msk.f32.mxu1 %vm705_vm0, %v704_v0  ;;  %p604_p2 = scmp.lt.s32.totalorder %s602_s5, %s596_s24 }
  0x1e   : > { %245 = vperm.xlu0 %594, %v236_v7   ;;  %p598_p13 = pnand %p597_p12, %p776_p4 }
  0x1f   : > { %p605_p3 = por %p604_p2, %p603_p1 }
  0x20   : > { %525 = vmatmul.mubr.msk.f32.gmra.mxu1 %vm253_vm2, %v234_v8  ;;  %p599_p0 = pneg %p598_p13 }
  0x22   : > { %p606_p5 = pnand %p605_p3, %p599_p0 }
  0x95   : > { %v241_v9 = vpop.permute.xlu0 %240  ;;  %v251_v15 = vpop.permute.xlu1 %250 }
  0x99   : > { %v246_v10 = vpop.permute.xlu0 %245 }
  0xdc   : > { %v333_v11 = vpop.f32.mrf.mxu0  ;;  %v338_v12 = vpop.f32.mrf.mxu1 }
  0xdd   : > { %v334_v13 = vadd.f32 %v333_v11, %v241_v9  ;;  %v339_v14 = vadd.f32 %v338_v12, %v246_v10 }
  0xde   : > { %v523_v16 = vpop.f32.mrf.mxu1  ;;  %v520_v17 = vpop.f32.mrf.mxu0 }
  0xdf   : > { %347 = vst [vmem:[%s216_s8] sm:$0xff] %v334_v13  ;;  %348 = vst [vmem:[%s823_s10] sm:$0xff] %v339_v14 }
  0xe0   : > { %v343_v18 = vpop.f32.mrf.mxu1 }
  0xe1   : > { %609 = shalt.err (!%p606_p5)
}
  0xe2   : > { %s610_s6 = scalar_lea.hbm %s829_s14, 128  ;;  %s614_s12 = scalar_lea.hbm %s914_s3, 256 }
  0xe3   : > { %p611_p6 = scmp.ne.s32.totalorder %s829_s14, %s610_s6  ;;  %p615_p10 = scmp.lt.s32.totalorder %s829_s14, %s914_s3 }
  0xe4   : > { %p616_p11 = scmp.lt.s32.totalorder %s614_s12, %s610_s6 }
  0xe5   : > { %p612_p7 = pnand %p611_p6, %p776_p4 }
  0xe6   : > { %p617_p12 = por %p616_p11, %p615_p10 }
  0xe7   : > { %p613_p9 = pneg %p612_p7 }
  0xe9   : > { %p618_p13 = pnand %p617_p12, %p613_p9 }
  0xeb   : > { %621 = shalt.err (!%p618_p13)
}
  0xec   : > { %529 = dma.vmem_to_hbm [thread:$0]  (%p776_p4), %s831_s9, 128, %s829_s14, %s351_s22   ;;  %v344_v19 = vadd.f32 %v343_v18, %v251_v15  ;;  %v526_v20 = vpop.f32.mrf.mxu1 }
  0xed   : > { %s863_s5 = scalar_lea.hbm %s915_s4, %s511_s21  ;;  %s356_s6 = scalar_lea.sflag [#allocation5], %s818_s30 }
  0xee   : > { %349 = vst [vmem:[%s823_s10 + $0x8] sm:$0xff] %v344_v19  ;;  %s622_s7 = scalar_lea.vmem %s833_s11, 256  ;;  %s708_s8 = smov [#allocation4]  }
  0xef   : > { %p623_p0 = scmp.ne.s32.totalorder %s833_s11, %s622_s7  ;;  %s626_s12 = sshll.u32 %s708_s8, 4  ;;  %s627_s12 = int_to_ptr.vmem [resolvable:$false] %s626_s12 }
  0xf0   : > { %s628_s13 = scalar_lea.vmem %s627_s12, 512  ;;  %p629_p3 = scmp.lt.s32.totalorder %s833_s11, %s627_s12 }
  0xf1   : > { %p624_p1 = pnand %p623_p0, %p776_p4  ;;  %p630_p5 = scmp.lt.s32.totalorder %s628_s13, %s622_s7 }
  0xf3   : > { %p625_p2 = pneg %p624_p1  ;;  %p631_p6 = por %p630_p5, %p629_p3 }
  0xf5   : > { %p632_p7 = pnand %p631_p6, %p625_p2 }
  0xf7   : > { %635 = shalt.err (!%p632_p7)
}
  0xf8   : > { %s636_s18 = scalar_lea.hbm %s863_s5, 256  ;;  %s640_s14 = scalar_lea.hbm %s915_s4, 512 }
  0xf9   : > { %p637_p9 = scmp.ne.s32.totalorder %s863_s5, %s636_s18  ;;  %p641_p12 = scmp.lt.s32.totalorder %s863_s5, %s915_s4 }
  0xfa   : > { %p642_p13 = scmp.lt.s32.totalorder %s640_s14, %s636_s18 }
  0xfb   : > { %p638_p10 = pnand %p637_p9, %p776_p4 }
  0xfc   : > { %p643_p0 = por %p642_p13, %p641_p12 }
  0xfd   : > { %p639_p11 = pneg %p638_p10 }
  0xff   : > { %p644_p1 = pnand %p643_p0, %p639_p11 }
 0x101   : > { %647 = shalt.err (!%p644_p1)
}
 0x102   : > { %s709_s26 = smov 128   ;;  %s710_s24 = smov 8  }
 0x103   : > { %530 = dma.vmem_to_hbm [thread:$0]  (%p776_p4), %s833_s11, 256, %s863_s5, %s356_s6, %s709_s26, %s709_s26, %s710_s24  }
 0x104 PF: > { %p540_p2 = scmp.ge.s32.totalorder %s702_s20, 2  ;;  %s399_s29 = sand.u32 1, %s682_s15  }
 0x105   : > { %s400_s7 = scalar_lea.sflag [#allocation3], %s399_s29 }
 0x106   : > { %p534_p3 = pnand %p540_p2, %p783_p8 }
 0x108   : > { %p535_p5 = pneg %p534_p3 }
 0x10a   : > { %673 = dma.done.wait (%p535_p5), %s400_s7, 128  }
 0x10b   : > { %675 = vsyncadd (%p535_p5), %s400_s7, 4294967168  ;;  %s409_s8 = scalar_lea.sflag [#allocation5], %s399_s29 }
 0x10c   : > { %677 = dma.done.wait (%p535_p5), %s409_s8, 256  }
 0x10d   : > { %679 = vsyncadd (%p535_p5), %s409_s8, 4294967040  ;;  %s21_s20 = sadd.s32 1, %s702_s20   ;;  %s918_s15 = smov %s686_s16 }
 0x10e   : > { %p18_p6 = scmp.ge.s32.totalorder %s21_s20, 4   ;;  %s919_s16 = smov %s690_s17 }
 0x10f   : > { %s920_s17 = smov %s789_s28  ;;  %s921_s18 = smov %s698_s19 }
 0x110   : > { %s922_s19 = smov %s924_s23  ;;  %20 = sbr.rel (!%p18_p6) target bundleno = 6 (0x6), region = 84 }
 0x115   :  { %414 = vsyncpa [#allocation3], 1 }
 0x116   :  { %416 = vsyncpa [#allocation3 + $0x1], 1 }
 0x117   :  { %417 = vsyncpa [#allocation5], 1 }
 0x118   :  { %419 = vsyncpa [#allocation5 + $0x1], 1 }

</bundles_post_ra>
